<compile_context>
chip_gen: v6e
topology: v6e:2x2x1
jax: 0.10.0
libtpu: 0.0.40
codegen_flags: <defaults>
</compile_context>

<pallas_src>
import functools

import jax
import jax.numpy as jnp
from jax import lax
from jax.experimental import pallas as pl
from jax.experimental.pallas import tpu as pltpu


def _round_up(x: int, m: int) -> int:
    return (x + m - 1) // m * m


def _supcon_kernel(a_ref, b_ref, rlab_ref, clab_ref, out_ref,
                   m_sc, l_sc, s_sc, p_sc, *,
                   inv_temp: float, num_pad_cols: float):
    j = pl.program_id(1)

    @pl.when(j == 0)
    def _():
        m_sc[...] = jnp.full_like(m_sc, -jnp.inf)   # running max of RAW dot products (self/pad incl.)
        l_sc[...] = jnp.zeros_like(l_sc)            # running sum exp((raw - m)*inv_temp) over ALL cols
        s_sc[...] = jnp.zeros_like(s_sc)            # running sum of raw over label matches (incl. self)
        p_sc[...] = jnp.zeros_like(p_sc)            # running label-match count (incl. self)

    # bf16 tiles feed the MXU directly; accumulate in f32 only.
    a = a_ref[...]                                   # (tq, d_pad) bf16, unscaled (resident over j)
    b = b_ref[...]                                   # (tk, d_pad) bf16 (streamed)
    raw = lax.dot_general(a, b,
                          dimension_numbers=(((1,), (1,)), ((), ())),
                          preferred_element_type=jnp.float32)      # (tq, tk) raw dot products

    # Only surviving (tq, tk) VPU work: one compare, one select, one scaled exp.
    pos = rlab_ref[...] == clab_ref[...]             # (tq, 1) == (1, tk) -> (tq, tk) bool

    # No col_real/not_self masking of the max: log_denom = m*it + log(l) is invariant in m.
    blk_max = jnp.max(raw, axis=1, keepdims=True)
    m_old = m_sc[...]
    m_new = jnp.maximum(m_old, blk_max)
    alpha = jnp.exp((m_old - m_new) * inv_temp)      # (tq, 1)
    p_exp = jnp.exp((raw - m_new) * inv_temp)        # (tq, tk), unmasked
    l_sc[...] = alpha * l_sc[...] + jnp.sum(p_exp, axis=1, keepdims=True)
    m_sc[...] = m_new

    s_sc[...] = s_sc[...] + jnp.sum(jnp.where(pos, raw, 0.0), axis=1, keepdims=True)
    p_sc[...] = p_sc[...] + jnp.sum(pos.astype(jnp.float32), axis=1, keepdims=True)

    @pl.when(j == pl.num_programs(1) - 1)
    def _():
        # O(tq) algebraic corrections replacing all per-step masking:
        #   * zero-padded columns contribute raw == 0 exactly -> subtract num_pad_cols*exp(-m*it)
        #   * the self column contributes raw == ||f_i||^2    -> subtract exp((||f_i||^2 - m)*it)
        #   * self always matches its own label               -> subtract ||f_i||^2 from s, 1 from p
        af = a.astype(jnp.float32)
        self_raw = jnp.sum(af * af, axis=1, keepdims=True)          # (tq, 1)
        m = m_sc[...]
        l_corr = (l_sc[...]
                  - jnp.float32(num_pad_cols) * jnp.exp(-m * inv_temp)
                  - jnp.exp((self_raw - m) * inv_temp))
        l_corr = jnp.maximum(l_corr, 0.0)
        log_denom = m * inv_temp + jnp.log(l_corr + 1e-12)           # log sum_{k!=i, real} exp(logit_ik)
        num_pos = p_sc[...] - 1.0
        s_pos = (s_sc[...] - self_raw) * inv_temp                    # sum over positives of logits
        mean_log_prob_pos = (s_pos - num_pos * log_denom) / (num_pos + 1e-12)
        out_ref[...] = -mean_log_prob_pos


def supcon_loss(features: jax.Array, labels: jax.Array, temperature: float = 0.07,
                block_q: int = 512, block_k: int = 1024,
                contrast_buffers=None) -> jax.Array:
    """features: [B, V, D] float, labels: [B] int. Returns scalar SupCon loss (float32)."""
    B, V, D = features.shape
    N = B * V
    d_pad = _round_up(D, 128)

    if N <= block_k:
        # Everything fits in one column block; still split rows in two so the "parallel"
        # axis has >=2 blocks and shards across both v7x TensorCores.
        n_pad = _round_up(N, 16)
        tk = n_pad
        tq = n_pad // 2
    else:
        assert block_k % block_q == 0, "block_q must divide block_k"
        tq, tk = block_q, block_k
        n_pad = _round_up(N, tk)          # tq | tk | n_pad -> grid math always exact

    # torch.cat(torch.unbind(features, dim=1), dim=0) == transpose(0,1) + flatten.
    # Keep the big matrix in bf16 end-to-end; padded rows/cols are exactly zero.
    cf = jnp.transpose(features, (1, 0, 2)).reshape(N, D).astype(jnp.bfloat16)
    cf = jnp.pad(cf, ((0, n_pad - N), (0, d_pad - D)))

    lab = jnp.tile(labels.reshape(-1).astype(jnp.int32), V)     # mask.repeat over views
    lab = jnp.pad(lab, (0, n_pad - N), constant_values=jnp.iinfo(jnp.int32).min)
    lab_col = lab.reshape(n_pad, 1)      # sublane orientation (per anchor row)
    lab_row = lab.reshape(1, n_pad)      # lane-dense orientation (per contrast col)

    grid = (n_pad // tq, n_pad // tk)
    kernel = functools.partial(_supcon_kernel,
                               inv_temp=1.0 / temperature,
                               num_pad_cols=float(n_pad - N))

    # Optionally deepen the streamed contrast tile's pipeline (e.g. 3 on v5e).
    b_kwargs = {}
    if contrast_buffers is not None and contrast_buffers != 2:
        b_kwargs["pipeline_mode"] = pl.Buffered(contrast_buffers)
    nbuf = contrast_buffers if contrast_buffers else 2

    # Explicit VMEM budget: covers v5e's 16 MiB default scoped limit while staying
    # inside v7x's 64 MiB physical VMEM.
    vmem_bytes = (2 * tq * d_pad * 2           # anchor tile, bf16, double-buffered
                  + nbuf * tk * d_pad * 2      # contrast tile, bf16, streamed
                  + 8 * tq * tk * 4            # live (tq, tk) f32/bool temporaries
                  + 32 * (tq + tk) * 4
                  + (1 << 20))
    vmem_limit = int(min(max(vmem_bytes, 16 << 20), 64 << 20))

    per_row = pl.pallas_call(
        kernel,
        out_shape=jax.ShapeDtypeStruct((n_pad, 1), jnp.float32),
        grid=grid,
        in_specs=[
            pl.BlockSpec((tq, d_pad), lambda i, j: (i, 0)),               # anchor rows (resident)
            pl.BlockSpec((tk, d_pad), lambda i, j: (j, 0), **b_kwargs),   # contrast cols (streamed)
            pl.BlockSpec((tq, 1), lambda i, j: (i, 0)),                   # row labels
            pl.BlockSpec((1, tk), lambda i, j: (0, j)),                   # col labels (lane-dense)
        ],
        out_specs=pl.BlockSpec((tq, 1), lambda i, j: (i, 0)),
        scratch_shapes=[pltpu.VMEM((tq, 1), jnp.float32)] * 4,            # m, l, s, num_pos
        compiler_params=pltpu.CompilerParams(
            dimension_semantics=("parallel", "arbitrary"),
            vmem_limit_bytes=vmem_limit),
        cost_estimate=pl.CostEstimate(
            flops=2 * n_pad * n_pad * d_pad,
            transcendentals=n_pad * n_pad,
            bytes_accessed=2 * n_pad * d_pad * (grid[0] + 1) + 4 * 5 * n_pad),
    )(cf, cf, lab_col, lab_row)

    return jnp.mean(per_row[:N, 0])


def _reference(features, labels, temperature=0.07, matmul_dtype=jnp.float32):
    """Pure-JAX re-implementation of the torch forward (optionally with bf16 matmul operands)."""
    B, V, D = features.shape
    N = B * V
    cf = jnp.transpose(features, (1, 0, 2)).reshape(N, D).astype(matmul_dtype)
    lab = jnp.tile(labels.reshape(-1), V).reshape(N, 1)
    mask = (lab == lab.T).astype(jnp.float32)
    logits = jnp.dot(cf, cf.T, preferred_element_type=jnp.float32) / temperature
    logits = logits - jnp.max(logits, axis=1, keepdims=True)
    logits_mask = 1.0 - jnp.eye(N, dtype=jnp.float32)
    mask = mask * logits_mask
    exp_logits = jnp.exp(logits) * logits_mask
    log_prob = logits - jnp.log(jnp.sum(exp_logits, axis=1, keepdims=True) + 1e-12)
    mean_log_prob_pos = jnp.sum(mask * log_prob, axis=1) / (jnp.sum(mask, axis=1) + 1e-12)
    return jnp.mean(-mean_log_prob_pos)


if __name__ == "__main__":
    key = jax.random.PRNGKey(0)
    k1, k2 = jax.random.split(key)

    B, V, D = 9, 2, 32        # N = 18 -> n_pad = 32: exercises the zero-padding corrections
    features = jax.random.normal(k1, (B, V, D), dtype=jnp.float32)
    # normalize features (typical SupCon usage); not required by the module itself
    features = features / jnp.linalg.norm(features, axis=-1, keepdims=True)
    labels = jax.random.randint(k2, (B,), 0, 4, dtype=jnp.int32)

    loss = jax.block_until_ready(supcon_loss(features, labels, temperature=0.07))

    # Tight check vs a reference using the same bf16 matmul operands (tests the kernel algebra)
    ref_bf16 = _reference(features, labels, 0.07, matmul_dtype=jnp.bfloat16)
    # Loose check vs the full-f32 torch-faithful reference (bf16 dtype tolerance)
    ref_f32 = _reference(features, labels, 0.07, matmul_dtype=jnp.float32)

    assert bool(jnp.isfinite(loss)), loss
    assert jnp.allclose(loss, ref_bf16, atol=1e-3, rtol=1e-3), (loss, ref_bf16)
    assert jnp.allclose(loss, ref_f32, atol=5e-2, rtol=5e-2), (loss, ref_f32)

    print("KERNEL_OK")
</pallas_src>

<mosaic_0001>
module attributes {stable_mosaic.version = 11 : i64} {
  func.func @_supcon_kernel(%arg0: i32, %arg1: i32, %arg2: memref<16x128xbf16, #tpu.memory_space<vmem>>, %arg3: memref<32x128xbf16, #tpu.memory_space<vmem>>, %arg4: memref<16x1xi32, #tpu.memory_space<vmem>>, %arg5: memref<1x32xi32, #tpu.memory_space<vmem>>, %arg6: memref<16x1xf32, #tpu.memory_space<vmem>>, %arg7: memref<16x1xf32, #tpu.memory_space<vmem>>, %arg8: memref<16x1xf32, #tpu.memory_space<vmem>>, %arg9: memref<16x1xf32, #tpu.memory_space<vmem>>, %arg10: memref<16x1xf32, #tpu.memory_space<vmem>>) attributes {dimension_semantics = [#tpu.dimension_semantics<parallel>, #tpu.dimension_semantics<arbitrary>], iteration_bounds = array<i64: 2, 1>, scalar_prefetch = 0 : i64, scratch_operands = 4 : i64, tpu.core_type = #tpu.core_type<tc>, window_params = [{transform_indices = @transform_0, window_bounds = array<i64: 16, 128>}, {transform_indices = @transform_1, window_bounds = array<i64: 32, 128>}, {transform_indices = @transform_2, window_bounds = array<i64: 16, 1>}, {transform_indices = @transform_3, window_bounds = array<i64: 1, 32>}, {transform_indices = @transform_4, window_bounds = array<i64: 16, 1>}]} {
    %c0_i32 = arith.constant 0 : i32
    %0 = arith.cmpi eq, %arg1, %c0_i32 : i32
    %1 = arith.extui %0 : i1 to i32
    %c0_i32_0 = arith.constant 0 : i32
    %2 = arith.cmpi ne, %1, %c0_i32_0 : i32
    scf.if %2 {
      %cst_33 = arith.constant 0xFF800000 : f32
      %48 = vector.broadcast %cst_33 : f32 to vector<16x1xf32>
      %c0_34 = arith.constant 0 : index
      %c0_35 = arith.constant 0 : index
      %49 = vector.load %arg7[%c0_34, %c0_35] : memref<16x1xf32, #tpu.memory_space<vmem>>, vector<16x1xf32>
      tpu.vector_store %arg7[%c0_34, %c0_35], %48 {strides = array<i32>} : memref<16x1xf32, #tpu.memory_space<vmem>>, vector<16x1xf32>,
      %cst_36 = arith.constant 0.000000e+00 : f32
      %50 = vector.broadcast %cst_36 : f32 to vector<16x1xf32>
      %c0_37 = arith.constant 0 : index
      %c0_38 = arith.constant 0 : index
      %51 = vector.load %arg8[%c0_37, %c0_38] : memref<16x1xf32, #tpu.memory_space<vmem>>, vector<16x1xf32>
      tpu.vector_store %arg8[%c0_37, %c0_38], %50 {strides = array<i32>} : memref<16x1xf32, #tpu.memory_space<vmem>>, vector<16x1xf32>,
      %cst_39 = arith.constant 0.000000e+00 : f32
      %52 = vector.broadcast %cst_39 : f32 to vector<16x1xf32>
      %c0_40 = arith.constant 0 : index
      %c0_41 = arith.constant 0 : index
      %53 = vector.load %arg9[%c0_40, %c0_41] : memref<16x1xf32, #tpu.memory_space<vmem>>, vector<16x1xf32>
      tpu.vector_store %arg9[%c0_40, %c0_41], %52 {strides = array<i32>} : memref<16x1xf32, #tpu.memory_space<vmem>>, vector<16x1xf32>,
      %cst_42 = arith.constant 0.000000e+00 : f32
      %54 = vector.broadcast %cst_42 : f32 to vector<16x1xf32>
      %c0_43 = arith.constant 0 : index
      %c0_44 = arith.constant 0 : index
      %55 = vector.load %arg10[%c0_43, %c0_44] : memref<16x1xf32, #tpu.memory_space<vmem>>, vector<16x1xf32>
      tpu.vector_store %arg10[%c0_43, %c0_44], %54 {strides = array<i32>} : memref<16x1xf32, #tpu.memory_space<vmem>>, vector<16x1xf32>,
    } else {
    }
    %c0 = arith.constant 0 : index
    %c0_1 = arith.constant 0 : index
    %3 = vector.load %arg2[%c0, %c0_1] : memref<16x128xbf16, #tpu.memory_space<vmem>>, vector<16x128xbf16>
    %c0_2 = arith.constant 0 : index
    %c0_3 = arith.constant 0 : index
    %4 = vector.load %arg3[%c0_2, %c0_3] : memref<32x128xbf16, #tpu.memory_space<vmem>>, vector<32x128xbf16>
    %cst = arith.constant dense<0.000000e+00> : vector<16x32xf32>
    %5 = tpu.matmul %3, %4, %cst {dimension_numbers = #tpu.dot_dimension_numbers<[1], [1], [0], [0], [0, 0, 1, 0], [], []>} : vector<16x128xbf16>, vector<32x128xbf16>, vector<16x32xf32> -> vector<16x32xf32>
    %c0_4 = arith.constant 0 : index
    %c0_5 = arith.constant 0 : index
    %6 = vector.load %arg4[%c0_4, %c0_5] : memref<16x1xi32, #tpu.memory_space<vmem>>, vector<16x1xi32>
    %c0_6 = arith.constant 0 : index
    %c0_7 = arith.constant 0 : index
    %7 = vector.load %arg5[%c0_6, %c0_7] : memref<1x32xi32, #tpu.memory_space<vmem>>, vector<1x32xi32>
    %8 = vector.broadcast %6 : vector<16x1xi32> to vector<16x32xi32>
    %9 = vector.broadcast %7 : vector<1x32xi32> to vector<16x32xi32>
    %10 = arith.cmpi eq, %8, %9 : vector<16x32xi32>
    %cst_8 = arith.constant dense<0xFF800000> : vector<16xf32>
    %11 = vector.multi_reduction <maximumf>, %5, %cst_8 [1] : vector<16x32xf32> to vector<16xf32>
    %12 = vector.shape_cast %11 : vector<16xf32> to vector<16x1xf32>
    %c0_9 = arith.constant 0 : index
    %c0_10 = arith.constant 0 : index
    %13 = vector.load %arg7[%c0_9, %c0_10] : memref<16x1xf32, #tpu.memory_space<vmem>>, vector<16x1xf32>
    %14 = arith.maximumf %13, %12 : vector<16x1xf32>
    %15 = arith.subf %13, %14 : vector<16x1xf32>
    %cst_11 = arith.constant 14.2857141 : f32
    %16 = vector.broadcast %cst_11 : f32 to vector<16x1xf32>
    %17 = arith.mulf %15, %16 : vector<16x1xf32>
    %18 = math.exp %17 : vector<16x1xf32>
    %19 = vector.broadcast %14 : vector<16x1xf32> to vector<16x32xf32>
    %20 = arith.subf %5, %19 : vector<16x32xf32>
    %cst_12 = arith.constant 14.2857141 : f32
    %21 = vector.broadcast %cst_12 : f32 to vector<16x32xf32>
    %22 = arith.mulf %20, %21 : vector<16x32xf32>
    %23 = math.exp %22 : vector<16x32xf32>
    %c0_13 = arith.constant 0 : index
    %c0_14 = arith.constant 0 : index
    %24 = vector.load %arg8[%c0_13, %c0_14] : memref<16x1xf32, #tpu.memory_space<vmem>>, vector<16x1xf32>
    %25 = arith.mulf %18, %24 : vector<16x1xf32>
    %cst_15 = arith.constant dense<0.000000e+00> : vector<16xf32>
    %26 = vector.multi_reduction <add>, %23, %cst_15 [1] : vector<16x32xf32> to vector<16xf32>
    %27 = vector.shape_cast %26 : vector<16xf32> to vector<16x1xf32>
    %28 = arith.addf %25, %27 : vector<16x1xf32>
    %c0_16 = arith.constant 0 : index
    %c0_17 = arith.constant 0 : index
    %29 = vector.load %arg8[%c0_16, %c0_17] : memref<16x1xf32, #tpu.memory_space<vmem>>, vector<16x1xf32>
    tpu.vector_store %arg8[%c0_16, %c0_17], %28 {strides = array<i32>} : memref<16x1xf32, #tpu.memory_space<vmem>>, vector<16x1xf32>,
    %c0_18 = arith.constant 0 : index
    %c0_19 = arith.constant 0 : index
    %30 = vector.load %arg7[%c0_18, %c0_19] : memref<16x1xf32, #tpu.memory_space<vmem>>, vector<16x1xf32>
    tpu.vector_store %arg7[%c0_18, %c0_19], %14 {strides = array<i32>} : memref<16x1xf32, #tpu.memory_space<vmem>>, vector<16x1xf32>,
    %c0_20 = arith.constant 0 : index
    %c0_21 = arith.constant 0 : index
    %31 = vector.load %arg9[%c0_20, %c0_21] : memref<16x1xf32, #tpu.memory_space<vmem>>, vector<16x1xf32>
    %cst_22 = arith.constant 0.000000e+00 : f32
    %32 = vector.broadcast %cst_22 : f32 to vector<16x32xf32>
    %33 = arith.select %10, %5, %32 : vector<16x32xi1>, vector<16x32xf32>
    %cst_23 = arith.constant dense<0.000000e+00> : vector<16xf32>
    %34 = vector.multi_reduction <add>, %33, %cst_23 [1] : vector<16x32xf32> to vector<16xf32>
    %35 = vector.shape_cast %34 : vector<16xf32> to vector<16x1xf32>
    %36 = arith.addf %31, %35 : vector<16x1xf32>
    %c0_24 = arith.constant 0 : index
    %c0_25 = arith.constant 0 : index
    %37 = vector.load %arg9[%c0_24, %c0_25] : memref<16x1xf32, #tpu.memory_space<vmem>>, vector<16x1xf32>
    tpu.vector_store %arg9[%c0_24, %c0_25], %36 {strides = array<i32>} : memref<16x1xf32, #tpu.memory_space<vmem>>, vector<16x1xf32>,
    %c0_26 = arith.constant 0 : index
    %c0_27 = arith.constant 0 : index
    %38 = vector.load %arg10[%c0_26, %c0_27] : memref<16x1xf32, #tpu.memory_space<vmem>>, vector<16x1xf32>
    %39 = arith.extui %10 : vector<16x32xi1> to vector<16x32xi32>
    %40 = arith.sitofp %39 : vector<16x32xi32> to vector<16x32xf32>
    %cst_28 = arith.constant dense<0.000000e+00> : vector<16xf32>
    %41 = vector.multi_reduction <add>, %40, %cst_28 [1] : vector<16x32xf32> to vector<16xf32>
    %42 = vector.shape_cast %41 : vector<16xf32> to vector<16x1xf32>
    %43 = arith.addf %38, %42 : vector<16x1xf32>
    %c0_29 = arith.constant 0 : index
    %c0_30 = arith.constant 0 : index
    %44 = vector.load %arg10[%c0_29, %c0_30] : memref<16x1xf32, #tpu.memory_space<vmem>>, vector<16x1xf32>
    tpu.vector_store %arg10[%c0_29, %c0_30], %43 {strides = array<i32>} : memref<16x1xf32, #tpu.memory_space<vmem>>, vector<16x1xf32>,
    %c0_i32_31 = arith.constant 0 : i32
    %45 = arith.cmpi eq, %arg1, %c0_i32_31 : i32
    %46 = arith.extui %45 : i1 to i32
    %c0_i32_32 = arith.constant 0 : i32
    %47 = arith.cmpi ne, %46, %c0_i32_32 : i32
    scf.if %47 {
      %48 = arith.extf %3 : vector<16x128xbf16> to vector<16x128xf32>
      %49 = arith.mulf %48, %48 : vector<16x128xf32>
      %cst_33 = arith.constant dense<0.000000e+00> : vector<16xf32>
      %50 = vector.multi_reduction <add>, %49, %cst_33 [1] : vector<16x128xf32> to vector<16xf32>
      %51 = vector.shape_cast %50 : vector<16xf32> to vector<16x1xf32>
      %c0_34 = arith.constant 0 : index
      %c0_35 = arith.constant 0 : index
      %52 = vector.load %arg7[%c0_34, %c0_35] : memref<16x1xf32, #tpu.memory_space<vmem>>, vector<16x1xf32>
      %c0_36 = arith.constant 0 : index
      %c0_37 = arith.constant 0 : index
      %53 = vector.load %arg8[%c0_36, %c0_37] : memref<16x1xf32, #tpu.memory_space<vmem>>, vector<16x1xf32>
      %cst_38 = arith.constant 0.000000e+00 : f32
      %54 = vector.broadcast %cst_38 : f32 to vector<16x1xf32>
      %55 = arith.subf %54, %52 : vector<16x1xf32>
      %cst_39 = arith.constant 14.2857141 : f32
      %56 = vector.broadcast %cst_39 : f32 to vector<16x1xf32>
      %57 = arith.mulf %55, %56 : vector<16x1xf32>
      %58 = math.exp %57 : vector<16x1xf32>
      %cst_40 = arith.constant 1.400000e+01 : f32
      %59 = vector.broadcast %cst_40 : f32 to vector<16x1xf32>
      %60 = arith.mulf %59, %58 : vector<16x1xf32>
      %61 = arith.subf %53, %60 : vector<16x1xf32>
      %62 = arith.subf %51, %52 : vector<16x1xf32>
      %cst_41 = arith.constant 14.2857141 : f32
      %63 = vector.broadcast %cst_41 : f32 to vector<16x1xf32>
      %64 = arith.mulf %62, %63 : vector<16x1xf32>
      %65 = math.exp %64 : vector<16x1xf32>
      %66 = arith.subf %61, %65 : vector<16x1xf32>
      %cst_42 = arith.constant 0.000000e+00 : f32
      %67 = vector.broadcast %cst_42 : f32 to vector<16x1xf32>
      %68 = arith.maximumf %66, %67 : vector<16x1xf32>
      %cst_43 = arith.constant 14.2857141 : f32
      %69 = vector.broadcast %cst_43 : f32 to vector<16x1xf32>
      %70 = arith.mulf %52, %69 : vector<16x1xf32>
      %cst_44 = arith.constant 9.99999996E-13 : f32
      %71 = vector.broadcast %cst_44 : f32 to vector<16x1xf32>
      %72 = arith.addf %68, %71 : vector<16x1xf32>
      %73 = math.log %72 : vector<16x1xf32>
      %74 = arith.addf %70, %73 : vector<16x1xf32>
      %c0_45 = arith.constant 0 : index
      %c0_46 = arith.constant 0 : index
      %75 = vector.load %arg10[%c0_45, %c0_46] : memref<16x1xf32, #tpu.memory_space<vmem>>, vector<16x1xf32>
      %cst_47 = arith.constant 1.000000e+00 : f32
      %76 = vector.broadcast %cst_47 : f32 to vector<16x1xf32>
      %77 = arith.subf %75, %76 : vector<16x1xf32>
      %c0_48 = arith.constant 0 : index
      %c0_49 = arith.constant 0 : index
      %78 = vector.load %arg9[%c0_48, %c0_49] : memref<16x1xf32, #tpu.memory_space<vmem>>, vector<16x1xf32>
      %79 = arith.subf %78, %51 : vector<16x1xf32>
      %cst_50 = arith.constant 14.2857141 : f32
      %80 = vector.broadcast %cst_50 : f32 to vector<16x1xf32>
      %81 = arith.mulf %79, %80 : vector<16x1xf32>
      %82 = arith.mulf %77, %74 : vector<16x1xf32>
      %83 = arith.subf %81, %82 : vector<16x1xf32>
      %cst_51 = arith.constant 9.99999996E-13 : f32
      %84 = vector.broadcast %cst_51 : f32 to vector<16x1xf32>
      %85 = arith.addf %77, %84 : vector<16x1xf32>
      %86 = arith.divf %83, %85 : vector<16x1xf32>
      %cst_52 = arith.constant 0.000000e+00 : f32
      %87 = vector.broadcast %cst_52 : f32 to vector<16x1xf32>
      %88 = arith.subf %87, %86 : vector<16x1xf32>
      %c0_53 = arith.constant 0 : index
      %c0_54 = arith.constant 0 : index
      %89 = vector.load %arg6[%c0_53, %c0_54] : memref<16x1xf32, #tpu.memory_space<vmem>>, vector<16x1xf32>
      tpu.vector_store %arg6[%c0_53, %c0_54], %88 {strides = array<i32>} : memref<16x1xf32, #tpu.memory_space<vmem>>, vector<16x1xf32>,
    } else {
    }
    return
  }
  func.func @transform_0(%arg0: i32, %arg1: i32) -> (i32, i32) {
    %c0_i32 = arith.constant 0 : i32
    %c0_i32_0 = arith.constant 0 : i32
    return %arg0, %c0_i32 : i32, i32
  }
  func.func @transform_1(%arg0: i32, %arg1: i32) -> (i32, i32) {
    %c0_i32 = arith.constant 0 : i32
    %c0_i32_0 = arith.constant 0 : i32
    return %arg1, %c0_i32 : i32, i32
  }
  func.func @transform_2(%arg0: i32, %arg1: i32) -> (i32, i32) {
    %c0_i32 = arith.constant 0 : i32
    %c0_i32_0 = arith.constant 0 : i32
    return %arg0, %c0_i32 : i32, i32
  }
  func.func @transform_3(%arg0: i32, %arg1: i32) -> (i32, i32) {
    %c0_i32 = arith.constant 0 : i32
    %c0_i32_0 = arith.constant 0 : i32
    return %c0_i32, %arg1 : i32, i32
  }
  func.func @transform_4(%arg0: i32, %arg1: i32) -> (i32, i32) {
    %c0_i32 = arith.constant 0 : i32
    %c0_i32_0 = arith.constant 0 : i32
    return %arg0, %c0_i32 : i32, i32
  }
}

</mosaic_0001>

<bundles_post_ra>
// kernel: tpu_custom_call.1
= control target key start
LH: loop header
LB: loop body
LE: loop exit
PB: predicated region body
PF: predicated region fallthrough
CT: control target
= control target key end

     0   :  { %s771_s15 = smov 0   ;;  %s773_s16 = smov 0   ;;  %s879_s0 = inlined_call_operand.vmem [shape: bf16[32,128], index: 0, kind: input, shape index: {}]   ;;  %s880_s1 = inlined_call_operand.vmem [shape: bf16[32,128], index: 1, kind: input, shape index: {}]   ;;  %s881_s2 = inlined_call_operand.vmem [shape: s32[32,1], index: 2, kind: input, shape index: {}]   ;;  %s882_s3 = inlined_call_operand.vmem [shape: s32[1,32], index: 3, kind: input, shape index: {}]   ;;  %s883_s4 = inlined_call_operand.vmem [shape: f32[32,1], index: 4, kind: output, shape index: {}]  }
   0x1   :  { %s775_s17 = smov 0  }
   0x2 LB: > { %s26_s18 = sadd.s32 1, %s736_s16  ;;  %p632_p0 = scmp.ge.s32.totalorder %s740_s17, 1  ;;  %s740_s17 = sphi %s775_s17, %s14_s17   ;;  %s736_s16 = sphi %s773_s16, %s885_s16   ;;  %s732_s15 = sphi %s771_s15, %s884_s15  }
   0x3   : > { %p28_p1 = scmp.ge.s32.totalorder %s26_s18, 2  ;;  %p205_p2 = scmp.lt.s32.totalorder %s740_s17, 3 }
   0x5   : > { %s887_s18 = smov (%p28_p1, %s26_s18), 0  ;;  %p206_p3 = pnand %p632_p0, %p205_p2 }
   0x6   : > { %s633_s21 = sshll.u32 (!%p206_p3), %s732_s15, 1 }
   0x7   : > { %209 = sbr.rel (%p206_p3) target bundleno = 695 (0x2b7), region = 36  ;;  %p245_p4 = scmp.lt.s32.totalorder (!%p206_p3), %s633_s21, 3 }
   0xc   : > { %v690_v0 = vld [vmem:[%s880_s1 + $0x8] sm:$0xff]   ;;  %v742_v1 = vmov 0.0   ;;  %vm743_vm0 = vmmov 0   ;;  %s889_s21 = smov (!%p245_p4, %s633_s21), 3  ;;  %v691_v2 = vld [vmem:[%s880_s1] sm:$0xff]   ;;  %v744_v4 = vmov 0  }
   0xd   : > { %652 = vmatprep.subr.bf16.mxu0 %v742_v1  ;;  %656 = vmatprep.mubr.msk.bf16.mxu0 %vm743_vm0, %v742_v1  ;;  %s634_s24 = sshll.u32 %s889_s21, 2  ;;  %vm276_vm1 = vcmask 7168   ;;  %v745_v5 = vmov -inf   ;;  %vm365_vm2 = vcmask 261120   ;;  %s636_s28 = sshll.u32 %s889_s21, 3 }
   0xe   : > { %653 = vmatpush3.bf16.xpose.msra.mxu0 %v690_v0  ;;  %s248_s27 = scalar_lea.vmem %s879_s0, %s634_s24  ;;  %689 = vset.pattern.permute.xlu0 %v744_v4  ;;  %277 = vst.msk [vmem:[#allocation2] sm:$0xff] %vm276_vm1, %v745_v5  ;;  %278 = vst.msk [vmem:[#allocation2 + $0x8] sm:$0xff] %vm276_vm1, %v745_v5  ;;  %s260_s5 = scalar_lea.vmem %s881_s2, %s636_s28  ;;  %v642_v35 = vld [vmem:[%s882_s3] ss:$0 sm:$0xff] }
   0xf   : > { %654 = vmatprep.subr.bf16.mxu0 %v742_v1  ;;  %v285_v3 = vld [vmem:[%s248_s27] sm:$0xff]   ;;  %688 = vset.pattern.permute.xlu1 %v744_v4  ;;  %279 = vst.msk [vmem:[#allocation3] sm:$0xff] %vm276_vm1, %v742_v1  ;;  %280 = vst.msk [vmem:[#allocation3 + $0x8] sm:$0xff] %vm276_vm1, %v742_v1  ;;  %v351_v21 = vld [vmem:[%s260_s5 + $0x8] sm:$0xff]  ;;  %s269_s10 = scalar_lea.vmem %s883_s4, %s636_s28 }
  0x10   : > { %281 = vst.msk [vmem:[#allocation4] sm:$0xff] %vm276_vm1, %v742_v1  ;;  %282 = vst.msk [vmem:[#allocation4 + $0x8] sm:$0xff] %vm276_vm1, %v742_v1  ;;  %v350_v12 = vld [vmem:[%s260_s5] sm:$0xff]  ;;  %v452_v22 = vunpack.c.l.bf16 %v285_v3  ;;  %v453_v24 = vunpack.c.h.bf16 %v285_v3 }
  0x11   : > { %283 = vst.msk [vmem:[#allocation5] sm:$0xff] %vm276_vm1, %v742_v1  ;;  %284 = vst.msk [vmem:[#allocation5 + $0x8] sm:$0xff] %vm276_vm1, %v742_v1 }
  0x12   : > { %v454_v23 = vmul.f32 %v452_v22, %v452_v22  ;;  %v455_v25 = vmul.f32 %v453_v24, %v453_v24 }
  0x15   : > { %v372_v13 = vld [vmem:[#allocation2] sm:$0xff]  ;;  %v373_v16 = vld [vmem:[#allocation2 + $0x8] sm:$0xff] }
  0x16   : > { %655 = vmatpush3.bf16.xpose.msra.mxu0 %v691_v2  ;;  %v402_v5 = vld [vmem:[#allocation3] sm:$0xff] }
  0x18   : > { %v434_v22 = vld [vmem:[#allocation5 + $0x8] sm:$0xff] }
  0x1d   : > { %657 = vmatmul.mubr.bf16.vlgmr.msra.gmra.mxu0 %v285_v3 }
  0xdd   : > { %v343_v6 = vpop.f32.mrf.mxu0 }
  0xde   : > { %v366_v7 = vsel %vm365_vm2, %v343_v6, -inf }
  0xdf   : > { %367 = vmax.xlane.f32.xlu0 %v366_v7  ;;  %v658_v8 = vpop.f32.mrf.mxu0 }
  0xe1   : > { %v346_v9 = vpop.f32.mrf.mxu0 }
  0xe2   : > { %v369_v10 = vsel %vm365_vm2, %v346_v9, -inf }
  0xe3   : > { %370 = vmax.xlane.f32.xlu0 %v369_v10  ;;  %v659_v11 = vpop.f32.mrf.mxu0  ;;  %v403_v10 = vld [vmem:[#allocation3 + $0x8] sm:$0xff] }
  0xf9   : > { %354 = vperm.xlu0 %689, %v350_v12  }
 0x168   : > { %v368_v14 = vpop.xlane.xlu0 %367 }
 0x169   : > { %v374_v15 = vmax.f32 %v372_v13, %v368_v14 }
 0x16b   : > { %v376_v17 = vsub.f32 %v372_v13, %v374_v15  ;;  %417 = vst.msk [vmem:[#allocation2] sm:$0xff] %vm276_vm1, %v374_v15  ;;  %386 = vperm.xlu1 %688, %v374_v15  }
 0x16c   : > { %v371_v18 = vpop.xlane.xlu0 %370 }
 0x16d   : > { %v375_v19 = vmax.f32 %v373_v16, %v371_v18  ;;  %v378_v49 = vmul.f32 14.285714, %v376_v17 }
 0x16f   : > { %v377_v20 = vsub.f32 %v373_v16, %v375_v19  ;;  %418 = vst.msk [vmem:[#allocation2 + $0x8] sm:$0xff] %vm276_vm1, %v375_v19  ;;  %391 = vperm.xlu1 %688, %v375_v19   ;;  %v380_v51 = vmul.f32 1.442695, %v378_v49  ;;  %v433_v16 = vld [vmem:[#allocation5] sm:$0xff] }
 0x171   : > { %v379_v52 = vmul.f32 14.285714, %v377_v20 }
 0x172   : > { %v839_v50 = vld [vmem:[#allocation2] sm:$0xff] }
 0x173   : > { %357 = vperm.xlu1 %688, %v351_v21   ;;  %v464_v53 = vsub.f32 0.0, %v839_v50  ;;  %v382_v56 = vmul.f32 1.442695, %v379_v52  ;;  %v488_v52 = vmul.f32 14.285714, %v839_v50 }
 0x174   : > { %v355_v36 = vpop.permute.xlu0 %354 }
 0x175   : > { %vm363_vm3 = vcmp.eq.s32.totalorder %v355_v36, %v642_v35  ;;  %v466_v57 = vmul.f32 14.285714, %v464_v53 }
 0x176   : > { %v643_v40 = vsel %vm363_vm3, 1.0, %v742_v1  ;;  %v421_v45 = vsel %vm363_vm3, %v343_v6, 0.0  ;;  %v844_v55 = vld [vmem:[#allocation2 + $0x8] sm:$0xff] }
 0x177   : > { %v439_v42 = vsel %vm365_vm2, %v643_v40, 0.0  ;;  %v423_v46 = vsel %vm365_vm2, %v421_v45, 0.0  ;;  %v465_v58 = vsub.f32 0.0, %v844_v55  ;;  %v468_v61 = vmul.f32 1.442695, %v466_v57 }
 0x179   : > { %v467_v62 = vmul.f32 14.285714, %v465_v58 }
 0x197   : > { %456 = vadd.xlane.f32.xlu1 %v454_v23 }
 0x19b   : > { %458 = vadd.xlane.f32.xlu1 %v455_v25 }
 0x1e6   : > { %v387_v26 = vpop.permute.xlu1 %386 }
 0x1e7   : > { %v394_v27 = vsub.f32 %v343_v6, %v387_v26 }
 0x1e9   : > { %v396_v28 = vmul.f32 14.285714, %v394_v27 }
 0x1ea   : > { %v392_v29 = vpop.permute.xlu1 %391 }
 0x1eb   : > { %v398_v30 = vmul.f32 1.442695, %v396_v28  ;;  %v395_v31 = vsub.f32 %v346_v9, %v392_v29 }
 0x1ed   : > { %694 = vpow2.f32 %v398_v30  ;;  %v397_v32 = vmul.f32 14.285714, %v395_v31  ;;  %v419_v30 = vld [vmem:[#allocation4] sm:$0xff] }
 0x1ee   : > { %v358_v39 = vpop.permute.xlu1 %357 }
 0x1ef   : > { %v400_v33 = vmul.f32 1.442695, %v397_v32  ;;  %vm364_vm4 = vcmp.eq.s32.totalorder %v358_v39, %v642_v35  ;;  %v420_v39 = vld [vmem:[#allocation4 + $0x8] sm:$0xff] }
 0x1f0   : > { %v644_v43 = vsel %vm364_vm4, 1.0, %v742_v1  ;;  %v422_v47 = vsel %vm364_vm4, %v346_v9, 0.0  ;;  %v470_v1 = vmul.f32 1.442695, %v467_v62 }
 0x1f1   : > { %696 = vpow2.f32 %v400_v33  ;;  %v442_v44 = vsel %vm365_vm2, %v644_v43, 0.0  ;;  %v426_v48 = vsel %vm365_vm2, %v422_v47, 0.0 }
 0x1f2   : > { %698 = vpow2.f32 %v380_v51 }
 0x1f3   : > { %700 = vpow2.f32 %v382_v56 }
 0x1f4   : > { %702 = vpow2.f32 %v468_v61  ;;  %v489_v61 = vmul.f32 14.285714, %v844_v55 }
 0x1f5   : > { %704 = vpow2.f32 %v470_v1 }
 0x1fa   : > { %v695_v34 = vpop.eup %694 }
 0x1fb   : > { %v406_v37 = vsel %vm365_vm2, %v695_v34, 0.0 }
 0x1fc   : > { %407 = vadd.xlane.f32.xlu0 %v406_v37 }
 0x1fe   : > { %v697_v38 = vpop.eup %696 }
 0x1ff   : > { %v409_v41 = vsel %vm365_vm2, %v697_v38, 0.0  ;;  %v699_v4 = vpop.eup %698 }
 0x200   : > { %410 = vadd.xlane.f32.xlu1 %v409_v41  ;;  %v404_v7 = vmul.f32 %v699_v4, %v402_v5  ;;  %v701_v8 = vpop.eup %700 }
 0x201   : > { %v405_v12 = vmul.f32 %v701_v8, %v403_v10  ;;  %v703_v15 = vpop.eup %702 }
 0x202   : > { %v472_v18 = vmul.f32 14.0, %v703_v15  ;;  %v705_v20 = vpop.eup %704 }
 0x203   : > { %v473_v26 = vmul.f32 14.0, %v705_v20 }
 0x204   : > { %440 = vadd.xlane.f32.xlu1 %v439_v42 }
 0x208   : > { %443 = vadd.xlane.f32.xlu1 %v442_v44 }
 0x20c   : > { %424 = vadd.xlane.f32.xlu1 %v423_v46 }
 0x210   : > { %427 = vadd.xlane.f32.xlu1 %v426_v48 }
 0x220   : > { %v842_v54 = vpop.xlane.xlu1 %456 }
 0x221   : > { %v476_v59 = vsub.f32 %v842_v54, %v839_v50 }
 0x223   : > { %v478_v63 = vmul.f32 14.285714, %v476_v59 }
 0x224   : > { %v849_v60 = vpop.xlane.xlu1 %458 }
 0x225   : > { %v477_v0 = vsub.f32 %v849_v60, %v844_v55  ;;  %v480_v2 = vmul.f32 1.442695, %v478_v63 }
 0x227   : > { %v479_v3 = vmul.f32 14.285714, %v477_v0  ;;  %706 = vpow2.f32 %v480_v2 }
 0x229   : > { %v482_v6 = vmul.f32 1.442695, %v479_v3 }
 0x22b   : > { %708 = vpow2.f32 %v482_v6 }
 0x234   : > { %v707_v24 = vpop.eup %706 }
 0x238   : > { %v709_v33 = vpop.eup %708 }
 0x285   : > { %v408_v9 = vpop.xlane.xlu0 %407 }
 0x286   : > { %v412_v11 = vadd.f32 %v408_v9, %v404_v7 }
 0x288   : > { %415 = vst.msk [vmem:[#allocation3] sm:$0xff] %vm276_vm1, %v412_v11 }
 0x289   : > { %v411_v13 = vpop.xlane.xlu1 %410 }
 0x28a   : > { %v413_v14 = vadd.f32 %v411_v13, %v405_v12 }
 0x28c   : > { %416 = vst.msk [vmem:[#allocation3 + $0x8] sm:$0xff] %vm276_vm1, %v413_v14 }
 0x28d   : > { %v441_v17 = vpop.xlane.xlu1 %440 }
 0x28e   : > { %v445_v19 = vadd.f32 %v441_v17, %v433_v16 }
 0x28f   : > { %v462_v21 = vld [vmem:[#allocation3] sm:$0xff] }
 0x290   : > { %v474_v23 = vsub.f32 %v462_v21, %v472_v18  ;;  %447 = vst.msk [vmem:[#allocation5] sm:$0xff] %vm276_vm1, %v445_v19 }
 0x291   : > { %v444_v25 = vpop.xlane.xlu1 %443 }
 0x292   : > { %v484_v27 = vsub.f32 %v474_v23, %v707_v24  ;;  %v446_v28 = vadd.f32 %v444_v25, %v434_v22 }
 0x293   : > { %v463_v29 = vld [vmem:[#allocation3 + $0x8] sm:$0xff] }
 0x294   : > { %v486_v31 = vmax.f32 %v484_v27, 0.0  ;;  %v475_v32 = vsub.f32 %v463_v29, %v473_v26  ;;  %448 = vst.msk [vmem:[#allocation5 + $0x8] sm:$0xff] %vm276_vm1, %v446_v28 }
 0x295   : > { %v425_v34 = vpop.xlane.xlu1 %424 }
 0x296   : > { %v490_v35 = vadd.f32 1e-12, %v486_v31  ;;  %v485_v36 = vsub.f32 %v475_v32, %v709_v33  ;;  %v429_v37 = vadd.f32 %v425_v34, %v419_v30 }
 0x297   : > { %v498_v38 = vld [vmem:[#allocation5] sm:$0xff] }
 0x298   : > { %710 = vlog2.f32 %v490_v35  ;;  %v487_v40 = vmax.f32 %v485_v36, 0.0  ;;  %v645_v41 = vadd.f32 -1.0, %v498_v38  ;;  %431 = vst.msk [vmem:[#allocation4] sm:$0xff] %vm276_vm1, %v429_v37 }
 0x299   : > { %v428_v42 = vpop.xlane.xlu1 %427 }
 0x29a   : > { %v491_v43 = vadd.f32 1e-12, %v487_v40  ;;  %v512_v44 = vadd.f32 1e-12, %v645_v41  ;;  %v430_v45 = vadd.f32 %v428_v42, %v420_v39 }
 0x29b   : > { %v499_v46 = vld [vmem:[#allocation5 + $0x8] sm:$0xff] }
 0x29c   : > { %712 = vlog2.f32 %v491_v43  ;;  %v646_v47 = vadd.f32 -1.0, %v499_v46  ;;  %432 = vst.msk [vmem:[#allocation4 + $0x8] sm:$0xff] %vm276_vm1, %v430_v45 }
 0x29d   : > { %714 = vrcp.f32 %v512_v44 }
 0x29e   : > { %v513_v48 = vadd.f32 1e-12, %v646_v47 }
 0x29f   : > { %v502_v49 = vld [vmem:[#allocation4] sm:$0xff] }
 0x2a0   : > { %716 = vrcp.f32 %v513_v48  ;;  %v504_v56 = vsub.f32 %v502_v49, %v842_v54 }
 0x2a2   : > { %v506_v0 = vmul.f32 14.285714, %v504_v56 }
 0x2a3   : > { %v503_v57 = vld [vmem:[#allocation4 + $0x8] sm:$0xff] }
 0x2a4   : > { %v505_v1 = vsub.f32 %v503_v57, %v849_v60 }
 0x2a5   : > { %v711_v51 = vpop.eup %710 }
 0x2a6   : > { %v493_v53 = vmul.f32 0.6931472, %v711_v51  ;;  %v507_v50 = vmul.f32 14.285714, %v505_v1 }
 0x2a8   : > { %v496_v58 = vadd.f32 %v493_v53, %v488_v52 }
 0x2a9   : > { %v713_v59 = vpop.eup %712 }
 0x2aa   : > { %v508_v62 = vmul.f32 %v645_v41, %v496_v58  ;;  %v495_v63 = vmul.f32 0.6931472, %v713_v59  ;;  %v715_v2 = vpop.eup %714 }
 0x2ac   : > { %v497_v3 = vadd.f32 %v495_v63, %v489_v61  ;;  %v510_v4 = vsub.f32 %v506_v0, %v508_v62 }
 0x2ad   : > { %v717_v8 = vpop.eup %716 }
 0x2ae   : > { %v509_v5 = vmul.f32 %v646_v47, %v497_v3  ;;  %v515_v6 = vmul.f32 %v715_v2, %v510_v4 }
 0x2b0   : > { %v518_v54 = vsub.f32 0.0, %v515_v6  ;;  %v511_v7 = vsub.f32 %v507_v50, %v509_v5 }
 0x2b2   : > { %520 = vst.msk [vmem:[%s269_s10] sm:$0xff] %vm276_vm1, %v518_v54  ;;  %v517_v55 = vmul.f32 %v717_v8, %v511_v7 }
 0x2b4   : > { %v519_v9 = vsub.f32 0.0, %v517_v55 }
 0x2b6   : > { %521 = vst.msk [vmem:[%s269_s10 + $0x8] sm:$0xff] %vm276_vm1, %v519_v9 }
 0x2b7 PF: > { %s14_s17 = sadd.s32 1, %s740_s17   ;;  %s884_s15 = smov %s736_s16 }
 0x2b8   : > { %p11_p5 = scmp.ge.s32.totalorder %s14_s17, 4   ;;  %s885_s16 = smov %s887_s18 }
 0x2ba   :  { %13 = sbr.rel (!%p11_p5) target bundleno = 2 (0x2), region = 83 }

</bundles_post_ra>
